<compile_context>
chip_gen: v5e
topology: v5e:2x2
jax: 0.10.0
libtpu: 0.0.40
codegen_flags: <defaults>
</compile_context>

<pallas_src>
import jax
import jax.numpy as jnp
from jax.experimental import pallas as pl
from jax.experimental.pallas import tpu as pltpu


def _discrete_cost_kernel(w_ref, x_ref, xlast_ref, xs_ref, p_ref, q_ref,
                          out_ref, acc_ref):
    """Streams lane-dense (bt, B*D) trajectory tiles; accumulates element-wise
    weighted |.| values into a VMEM scratch; reduces to a scalar (plus the
    terminal cost) only in the epilogue."""
    i = pl.program_id(0)            # "parallel" split (megacore / v7x 2 TCs)
    j = pl.program_id(1)            # "arbitrary" reduction axis (row tiles)
    nj = pl.num_programs(1)

    @pl.when(j == 0)
    def _init():
        acc_ref[...] = jnp.zeros_like(acc_ref)

    # Steady state: pure element-wise VPU work, no per-tile XLU reductions.
    x = x_ref[...].astype(jnp.float32)                       # (bt, BD) f32 math
    acc_ref[...] += jnp.abs((x - xs_ref[...]) * q_ref[...]) * w_ref[...]

    @pl.when(j == nj - 1)
    def _finalize():
        partial = jnp.sum(acc_ref[...])                      # one full reduce
        # Terminal cost mean_b ||(X[-1]-X*)*P||_1 (the 1/B mean is folded into
        # p_ref in the wrapper); only the first parallel split adds it.
        term = jnp.where(
            i == 0,
            jnp.sum(jnp.abs((xlast_ref[...].astype(jnp.float32) - xs_ref[...])
                            * p_ref[...])),
            0.0)
        # Lane/sublane-dense (8,128) output block, written once per split.
        out_ref[...] = jnp.full((8, 128), partial + term, dtype=jnp.float32)


def discrete_cost(t, X, X_star, P, Q, *, t0, tf, block_rows=256, num_splits=2):
    """Pallas DiscreteCost forward.  t: (T,), X: (T,B,D), X_star/P/Q: (D,)."""
    T, B, D = X.shape
    BD = B * D

    # --- O(T)/O(D) prep stays in plain JAX (outside the streaming loop) ------
    t = t.astype(jnp.float32)
    decay = jnp.clip((t - t0) / (tf - t0), 0.0, 1.0)                   # (T,)
    # Fold decay normalisation (T/sum(decay)) and the running-cost mean
    # (1/(T*B)) into one per-row weight: w[t] = decay[t] / (B * sum(decay)).
    # (NaN/Inf if sum(decay)==0 or tf==t0 — matches the PyTorch module.)
    w = decay / (jnp.sum(decay) * B)                                    # (T,)

    # Lane-dense 2-D views.  X keeps its input dtype (bf16 halves HBM bytes).
    X2 = X.reshape(T, BD)
    x_last = X[-1].reshape(1, BD)
    xs_b = jnp.tile(X_star.astype(jnp.float32), B).reshape(1, BD)
    q_b = jnp.tile(Q.astype(jnp.float32), B).reshape(1, BD)
    p_b = jnp.tile(P.astype(jnp.float32) / B, B).reshape(1, BD)         # 1/B folded

    # --- tile sizing: 2 input buffers + f32 accumulator, conservative for v7x
    in_bytes = X2.dtype.itemsize
    row_bytes = BD * (2 * in_bytes + 4)
    vmem_budget = 8 * 1024 * 1024
    bt_cap = max(8, (vmem_budget // row_bytes) // 8 * 8)
    bt = int(max(8, min(block_rows, bt_cap, ((T + 7) // 8) * 8)))

    # Pad rows so T_pad = num_splits * blocks_per_split * bt; padded rows have
    # weight 0 so they contribute nothing.
    chunk = num_splits * bt
    T_pad = ((T + chunk - 1) // chunk) * chunk
    if T_pad != T:
        X2 = jnp.pad(X2, ((0, T_pad - T), (0, 0)))
        w = jnp.pad(w, (0, T_pad - T))
    w2 = w.reshape(T_pad, 1)
    bps = T_pad // (num_splits * bt)            # row-tiles per parallel split

    row_map = lambda i, j: (i * bps + j, 0)
    const_map = lambda i, j: (0, 0)

    out = pl.pallas_call(
        _discrete_cost_kernel,
        out_shape=jax.ShapeDtypeStruct((num_splits * 8, 128), jnp.float32),
        grid=(num_splits, bps),
        in_specs=[
            pl.BlockSpec((bt, 1), row_map),     # per-row decay weight
            pl.BlockSpec((bt, BD), row_map),    # trajectory tile (streamed)
            pl.BlockSpec((1, BD), const_map),   # X[-1]   (terminal)
            pl.BlockSpec((1, BD), const_map),   # X_star  (tiled over batch)
            pl.BlockSpec((1, BD), const_map),   # P / B
            pl.BlockSpec((1, BD), const_map),   # Q
        ],
        out_specs=pl.BlockSpec((8, 128), lambda i, j: (i, 0)),
        scratch_shapes=[pltpu.VMEM((bt, BD), jnp.float32)],
        compiler_params=pltpu.CompilerParams(
            dimension_semantics=("parallel", "arbitrary")),
    )(w2, X2, x_last, xs_b, p_b, q_b)

    # Each split filled its dense 8x128 block with its partial cost.
    return jnp.sum(out[::8, 0])


def discrete_cost_reference(t, X, X_star, P, Q, *, t0, tf):
    """Pure-JAX reference mirroring the PyTorch forward (modulo = identity)."""
    T = t.shape[0]
    decay = jnp.clip((t - t0) / (tf - t0), 0.0, 1.0)
    decay_n = (decay * (T / jnp.sum(decay)))[:, None]          # (T, 1)
    cost = jnp.mean(jnp.sum(jnp.abs((X[-1] - X_star) * P), axis=-1))
    cost += jnp.mean(jnp.sum(jnp.abs((X - X_star) * Q), axis=-1) * decay_n)
    return cost


if __name__ == "__main__":
    # t_span = 8, batch = 4, state_dim = 32 (control_dim unused since u=None).
    T, B, D = 8, 4, 32
    t0, tf = 0.0, 1.0

    key = jax.random.PRNGKey(0)
    k_x, k_xs, k_p, k_q = jax.random.split(key, 4)

    X = jax.random.normal(k_x, (T, B, D), dtype=jnp.float32)
    X_star = jax.random.normal(k_xs, (D,), dtype=jnp.float32)
    # Module defaults are P=zeros, Q=ones; use positive weights so both terms
    # are exercised.  Timestamps extend past [t0, tf] to exercise the clamp.
    P = jax.random.uniform(k_p, (D,), dtype=jnp.float32)
    Q = jax.random.uniform(k_q, (D,), dtype=jnp.float32) + 0.5
    t = jnp.linspace(-0.1, 1.1, T, dtype=jnp.float32)

    out = jax.block_until_ready(discrete_cost(t, X, X_star, P, Q, t0=t0, tf=tf))
    ref = discrete_cost_reference(t, X, X_star, P, Q, t0=t0, tf=tf)
    assert jnp.allclose(out, ref, rtol=1e-5, atol=1e-5), (out, ref)

    # bf16 trajectory with uneven T: exercises row padding, multi-tile
    # streaming, and the bf16-DMA / f32-compute path.
    T2 = 20
    X_bf16 = jax.random.normal(jax.random.PRNGKey(1), (T2, B, D),
                               dtype=jnp.float32).astype(jnp.bfloat16)
    t2 = jnp.linspace(-0.2, 1.3, T2, dtype=jnp.float32)
    out2 = jax.block_until_ready(
        discrete_cost(t2, X_bf16, X_star, P, Q, t0=t0, tf=tf, block_rows=8))
    ref2 = discrete_cost_reference(t2, X_bf16.astype(jnp.float32), X_star, P, Q,
                                   t0=t0, tf=tf)
    assert jnp.allclose(out2, ref2, rtol=1e-4, atol=1e-5), (out2, ref2)

    print("KERNEL_OK")
</pallas_src>

<mosaic_0001>
module attributes {stable_mosaic.version = 11 : i64} {
  func.func @_discrete_cost_kernel(%arg0: i32, %arg1: i32, %arg2: memref<8x1xf32, #tpu.memory_space<vmem>>, %arg3: memref<8x128xf32, #tpu.memory_space<vmem>>, %arg4: memref<1x128xf32, #tpu.memory_space<vmem>>, %arg5: memref<1x128xf32, #tpu.memory_space<vmem>>, %arg6: memref<1x128xf32, #tpu.memory_space<vmem>>, %arg7: memref<1x128xf32, #tpu.memory_space<vmem>>, %arg8: memref<8x128xf32, #tpu.memory_space<vmem>>, %arg9: memref<8x128xf32, #tpu.memory_space<vmem>>) attributes {dimension_semantics = [#tpu.dimension_semantics<parallel>, #tpu.dimension_semantics<arbitrary>], iteration_bounds = array<i64: 2, 1>, scalar_prefetch = 0 : i64, scratch_operands = 1 : i64, tpu.core_type = #tpu.core_type<tc>, window_params = [{transform_indices = @transform_0, window_bounds = array<i64: 8, 1>}, {transform_indices = @transform_1, window_bounds = array<i64: 8, 128>}, {pipeline_mode = #tpu.pipeline_mode<synchronous>, transform_indices = @transform_2, window_bounds = array<i64: 1, 128>}, {pipeline_mode = #tpu.pipeline_mode<synchronous>, transform_indices = @transform_3, window_bounds = array<i64: 1, 128>}, {pipeline_mode = #tpu.pipeline_mode<synchronous>, transform_indices = @transform_4, window_bounds = array<i64: 1, 128>}, {pipeline_mode = #tpu.pipeline_mode<synchronous>, transform_indices = @transform_5, window_bounds = array<i64: 1, 128>}, {transform_indices = @transform_6, window_bounds = array<i64: 8, 128>}]} {
    %c0_i32 = arith.constant 0 : i32
    %0 = arith.cmpi eq, %arg1, %c0_i32 : i32
    %1 = arith.extui %0 : i1 to i32
    %c0_i32_0 = arith.constant 0 : i32
    %2 = arith.cmpi ne, %1, %c0_i32_0 : i32
    scf.if %2 {
      %cst = arith.constant 0.000000e+00 : f32
      %20 = vector.broadcast %cst : f32 to vector<8x128xf32>
      %c0_14 = arith.constant 0 : index
      %c0_15 = arith.constant 0 : index
      %21 = vector.load %arg9[%c0_14, %c0_15] : memref<8x128xf32, #tpu.memory_space<vmem>>, vector<8x128xf32>
      tpu.vector_store %arg9[%c0_14, %c0_15], %20 {strides = array<i32>} : memref<8x128xf32, #tpu.memory_space<vmem>>, vector<8x128xf32>,
    } else {
    }
    %c0 = arith.constant 0 : index
    %c0_1 = arith.constant 0 : index
    %3 = vector.load %arg3[%c0, %c0_1] : memref<8x128xf32, #tpu.memory_space<vmem>>, vector<8x128xf32>
    %c0_2 = arith.constant 0 : index
    %c0_3 = arith.constant 0 : index
    %4 = vector.load %arg9[%c0_2, %c0_3] : memref<8x128xf32, #tpu.memory_space<vmem>>, vector<8x128xf32>
    %c0_4 = arith.constant 0 : index
    %c0_5 = arith.constant 0 : index
    %5 = vector.load %arg5[%c0_4, %c0_5] : memref<1x128xf32, #tpu.memory_space<vmem>>, vector<1x128xf32>
    %6 = vector.broadcast %5 : vector<1x128xf32> to vector<8x128xf32>
    %7 = arith.subf %3, %6 : vector<8x128xf32>
    %c0_6 = arith.constant 0 : index
    %c0_7 = arith.constant 0 : index
    %8 = vector.load %arg7[%c0_6, %c0_7] : memref<1x128xf32, #tpu.memory_space<vmem>>, vector<1x128xf32>
    %9 = vector.broadcast %8 : vector<1x128xf32> to vector<8x128xf32>
    %10 = arith.mulf %7, %9 : vector<8x128xf32>
    %11 = math.absf %10 : vector<8x128xf32>
    %c0_8 = arith.constant 0 : index
    %c0_9 = arith.constant 0 : index
    %12 = vector.load %arg2[%c0_8, %c0_9] : memref<8x1xf32, #tpu.memory_space<vmem>>, vector<8x1xf32>
    %13 = vector.broadcast %12 : vector<8x1xf32> to vector<8x128xf32>
    %14 = arith.mulf %11, %13 : vector<8x128xf32>
    %15 = arith.addf %4, %14 : vector<8x128xf32>
    %c0_10 = arith.constant 0 : index
    %c0_11 = arith.constant 0 : index
    %16 = vector.load %arg9[%c0_10, %c0_11] : memref<8x128xf32, #tpu.memory_space<vmem>>, vector<8x128xf32>
    tpu.vector_store %arg9[%c0_10, %c0_11], %15 {strides = array<i32>} : memref<8x128xf32, #tpu.memory_space<vmem>>, vector<8x128xf32>,
    %c0_i32_12 = arith.constant 0 : i32
    %17 = arith.cmpi eq, %arg1, %c0_i32_12 : i32
    %18 = arith.extui %17 : i1 to i32
    %c0_i32_13 = arith.constant 0 : i32
    %19 = arith.cmpi ne, %18, %c0_i32_13 : i32
    scf.if %19 {
      %c0_14 = arith.constant 0 : index
      %c0_15 = arith.constant 0 : index
      %20 = vector.load %arg9[%c0_14, %c0_15] : memref<8x128xf32, #tpu.memory_space<vmem>>, vector<8x128xf32>
      %21 = vector.shape_cast %20 : vector<8x128xf32> to vector<1x8x128xf32>
      %cst = arith.constant dense<0.000000e+00> : vector<1xf32>
      %22 = vector.multi_reduction <add>, %21, %cst [1, 2] : vector<1x8x128xf32> to vector<1xf32>
      %23 = vector.shape_cast %22 : vector<1xf32> to vector<1x1x1xf32>
      %24 = vector.extract %23[0, 0, 0] : f32 from vector<1x1x1xf32>
      %c0_i32_16 = arith.constant 0 : i32
      %25 = arith.cmpi eq, %arg0, %c0_i32_16 : i32
      %c0_17 = arith.constant 0 : index
      %c0_18 = arith.constant 0 : index
      %26 = vector.load %arg4[%c0_17, %c0_18] : memref<1x128xf32, #tpu.memory_space<vmem>>, vector<1x128xf32>
      %c0_19 = arith.constant 0 : index
      %c0_20 = arith.constant 0 : index
      %27 = vector.load %arg5[%c0_19, %c0_20] : memref<1x128xf32, #tpu.memory_space<vmem>>, vector<1x128xf32>
      %28 = arith.subf %26, %27 : vector<1x128xf32>
      %c0_21 = arith.constant 0 : index
      %c0_22 = arith.constant 0 : index
      %29 = vector.load %arg6[%c0_21, %c0_22] : memref<1x128xf32, #tpu.memory_space<vmem>>, vector<1x128xf32>
      %30 = arith.mulf %28, %29 : vector<1x128xf32>
      %31 = math.absf %30 : vector<1x128xf32>
      %32 = vector.shape_cast %31 : vector<1x128xf32> to vector<1x1x128xf32>
      %cst_23 = arith.constant dense<0.000000e+00> : vector<1xf32>
      %33 = vector.multi_reduction <add>, %32, %cst_23 [1, 2] : vector<1x1x128xf32> to vector<1xf32>
      %34 = vector.shape_cast %33 : vector<1xf32> to vector<1x1x1xf32>
      %35 = vector.extract %34[0, 0, 0] : f32 from vector<1x1x1xf32>
      %cst_24 = arith.constant 0.000000e+00 : f32
      %36 = arith.select %25, %35, %cst_24 : f32
      %37 = arith.addf %24, %36 : f32
      %38 = vector.broadcast %37 : f32 to vector<8x128xf32>
      %c0_25 = arith.constant 0 : index
      %c0_26 = arith.constant 0 : index
      %39 = vector.load %arg8[%c0_25, %c0_26] : memref<8x128xf32, #tpu.memory_space<vmem>>, vector<8x128xf32>
      tpu.vector_store %arg8[%c0_25, %c0_26], %38 {strides = array<i32>} : memref<8x128xf32, #tpu.memory_space<vmem>>, vector<8x128xf32>,
    } else {
    }
    return
  }
  func.func @transform_0(%arg0: i32, %arg1: i32) -> (i32, i32) {
    %c1_i32 = arith.constant 1 : i32
    %0 = arith.muli %arg0, %c1_i32 : i32
    %1 = arith.addi %0, %arg1 : i32
    %c0_i32 = arith.constant 0 : i32
    %c0_i32_0 = arith.constant 0 : i32
    return %1, %c0_i32 : i32, i32
  }
  func.func @transform_1(%arg0: i32, %arg1: i32) -> (i32, i32) {
    %c1_i32 = arith.constant 1 : i32
    %0 = arith.muli %arg0, %c1_i32 : i32
    %1 = arith.addi %0, %arg1 : i32
    %c0_i32 = arith.constant 0 : i32
    %c0_i32_0 = arith.constant 0 : i32
    return %1, %c0_i32 : i32, i32
  }
  func.func @transform_2(%arg0: i32, %arg1: i32) -> (i32, i32) {
    %c0_i32 = arith.constant 0 : i32
    %c0_i32_0 = arith.constant 0 : i32
    %c0_i32_1 = arith.constant 0 : i32
    return %c0_i32, %c0_i32_0 : i32, i32
  }
  func.func @transform_3(%arg0: i32, %arg1: i32) -> (i32, i32) {
    %c0_i32 = arith.constant 0 : i32
    %c0_i32_0 = arith.constant 0 : i32
    %c0_i32_1 = arith.constant 0 : i32
    return %c0_i32, %c0_i32_0 : i32, i32
  }
  func.func @transform_4(%arg0: i32, %arg1: i32) -> (i32, i32) {
    %c0_i32 = arith.constant 0 : i32
    %c0_i32_0 = arith.constant 0 : i32
    %c0_i32_1 = arith.constant 0 : i32
    return %c0_i32, %c0_i32_0 : i32, i32
  }
  func.func @transform_5(%arg0: i32, %arg1: i32) -> (i32, i32) {
    %c0_i32 = arith.constant 0 : i32
    %c0_i32_0 = arith.constant 0 : i32
    %c0_i32_1 = arith.constant 0 : i32
    return %c0_i32, %c0_i32_0 : i32, i32
  }
  func.func @transform_6(%arg0: i32, %arg1: i32) -> (i32, i32) {
    %c0_i32 = arith.constant 0 : i32
    %c0_i32_0 = arith.constant 0 : i32
    return %arg0, %c0_i32 : i32, i32
  }
}

</mosaic_0001>

<bundles_post_ra>
// kernel: tpu_custom_call.1
= control target key start
LH: loop header
LB: loop body
LE: loop exit
PB: predicated region body
PF: predicated region fallthrough
CT: control target
= control target key end

     0   :  { %11 = vsyncpa [#allocation4], 0  ;;  %s754_s0 = inlined_call_operand.vmem [shape: f32[16,1], index: 0, kind: input, shape index: {}]   ;;  %s755_s1 = inlined_call_operand.vmem [shape: f32[16,128], index: 1, kind: input, shape index: {}]   ;;  %s756_s2 = inlined_call_operand.vmem [shape: f32[1,128], index: 2, kind: input, shape index: {}]   ;;  %s757_s3 = inlined_call_operand.vmem [shape: f32[1,128], index: 3, kind: input, shape index: {}]   ;;  %s758_s4 = inlined_call_operand.vmem [shape: f32[1,128], index: 4, kind: input, shape index: {}]   ;;  %s759_s5 = inlined_call_operand.vmem [shape: f32[1,128], index: 5, kind: input, shape index: {}]   ;;  %s760_s6 = inlined_call_operand.hbm [shape: f32[16,128], index: 6, kind: output, shape index: {}]  }
   0x1   :  { %13 = vsyncpa [#allocation4 + $0x1], 0  ;;  %s638_s21 = smov 0   ;;  %s640_s22 = smov 0  }
   0x2   :  { %s642_s23 = smov 0   ;;  %s644_s24 = smov 0  }
   0x3   :  { %s646_s25 = smov 0   ;;  %s648_s26 = smov 0  }
   0x4 LB: > { %s447_s27 = sadd.s32 4294967295, %s600_s26   ;;  %s448_s28 = sadd.s32 4294967294, %s600_s26   ;;  %s600_s26 = sphi %s648_s26, %s19_s26   ;;  %s596_s25 = sphi %s646_s25, %s767_s25   ;;  %s592_s24 = sphi %s644_s24, %s766_s24   ;;  %s588_s23 = sphi %s642_s23, %s765_s23   ;;  %s584_s22 = sphi %s640_s22, %s764_s22   ;;  %s580_s21 = sphi %s638_s21, %s763_s21  }
   0x5   : > { %s31_s29 = sadd.s32 1, %s596_s25  ;;  %s178_s30 = sadd.s32 1, %s588_s23 }
   0x6   : > { %p33_p0 = scmp.ge.s32.totalorder %s31_s29, 2  ;;  %p188_p1 = scmp.ne.s32.totalorder %s588_s23, %s584_s22 }
   0x7   : > { %p189_p2 = scmp.eq.s32.totalorder %s447_s27, 1  ;;  %p194_p3 = scmp.ne.s32.totalorder %s584_s22, %s580_s21 }
   0x8   : > { %s769_s29 = smov (%p33_p0, %s31_s29), 0  ;;  %p195_p5 = scmp.eq.s32.totalorder %s448_s28, 1 }
   0x9   : > { %p678_p4 = por %p189_p2, %p188_p1  ;;  %s175_s8 = ssub.s32 %s596_s25, %s769_s29 }
   0xa   : > { %p451_p6 = scmp.ge.s32.totalorder %s600_s26, 1  ;;  %p176_p7 = scmp.eq.s32.totalorder %s175_s8, 0 }
   0xb   : > { %p685_p8 = por %p195_p5, %p194_p3  ;;  %p243_p9 = scmp.lt.s32.totalorder %s600_s26, 3 }
   0xc   : > { %s691_s10 = scalar_select %p176_p7, %s588_s23, %s178_s30  }
   0xd   : > { %p244_p10 = pnand %p451_p6, %p243_p9 }
   0xe   : > { %p279_p11 = scmp.lt.s32.totalorder (!%p244_p10), %s592_s24, 1  ;;  %s275_s15 = sand.u32 (!%p244_p10), 1, %s584_s22  }
   0xf   : > { %247 = sbr.rel (%p244_p10) target bundleno = 328 (0x148), region = 44  ;;  %s452_s16 = sshll.u32 (!%p244_p10), %s275_s15, 3 }
  0x10   : > { %p330_p12 = scmp.eq.s32.totalorder (!%p244_p10), %s592_s24, 0  ;;  %s277_s28 = scalar_lea.vmem (!%p244_p10), [#allocation3], %s452_s16 }
  0x11   : > { %s365_s30 = sshll.u32 (!%p244_p10), %s277_s28, 4  ;;  %s353_s13 = scalar_lea.sflag (!%p244_p10), [#allocation4], %s275_s15  ;;  %s366_s30 = int_to_ptr.vmem [resolvable:$true] %s365_s30 }
  0x12   : > { %s542_s16 = scalar_lea.hbm (!%p244_p10), %s760_s6, 16 }
  0x14   : > { %v602_v0 = vmov 0   ;;  %v331_v1 = vld [vmem:[%s756_s2] sm:$0x1]  ;;  %s280_s17 = scalar_select %p279_p11, %s592_s24, 1  ;;  %vm337_vm0 = vcmask 1040384  }
  0x15   : > { %519 = vset.pattern.permute.xlu0 %v602_v0  ;;  %v332_v2 = vld [vmem:[%s757_s3] sm:$0x1] }
  0x16   : > { %v334_v3 = vld [vmem:[%s758_s4] sm:$0x1]  ;;  %v333_v4 = vsub.f32 %v331_v1, %v332_v2  ;;  %s453_s18 = sshll.u32 %s280_s17, 3  ;;  %s456_s17 = sshll.u32 %s592_s24, 3 }
  0x17   : > { %s282_s27 = scalar_lea.vmem %s754_s0, %s453_s18  ;;  %s288_s8 = scalar_lea.vmem %s755_s1, %s453_s18  ;;  %v520_v9 = vld [vmem:[%s757_s3] ss:$0 sm:$0xff] }
  0x18   : > { %v335_v5 = vmul.f32 %v334_v3, %v333_v4  ;;  %v308_v6 = vld [vmem:[%s282_s27] sm:$0xff]  ;;  %s363_s20 = scalar_lea.hbm %s760_s6, %s456_s17 }
  0x19   : > { %311 = vperm.xlu0 %519, %v308_v6   ;;  %v295_v10 = vld [vmem:[%s288_s8] sm:$0xff]  ;;  %s367_s11 = sshll.u32 %s363_s20, 4  ;;  %s368_s11 = int_to_ptr.hbm [resolvable:$true] %s367_s11 }
  0x1a   : > { %v336_v7 = vand.u32 2147483647, %v335_v5  ;;  %v301_v11 = vsub.f32 %v295_v10, %v520_v9  ;;  %v521_v12 = vld [vmem:[%s759_s5] ss:$0 sm:$0xff]  ;;  %s536_s14 = sshra.s32 %s368_s11, 4  ;;  %s537_s14 = int_to_ptr.hbm [resolvable:$true] %s536_s14 }
  0x1b   : > { %s538_s24 = scalar_lea.hbm %s537_s14, 8  ;;  %p543_p2 = scmp.lt.s32.totalorder %s537_s14, %s760_s6 }
  0x1c   : > { %v338_v8 = vsel %vm337_vm0, %v336_v7, 0.0  ;;  %v306_v13 = vmul.f32 %v521_v12, %v301_v11  ;;  %p539_p13 = scmp.ne.s32.totalorder %s537_s14, %s538_s24  ;;  %p544_p3 = scmp.lt.s32.totalorder %s542_s16, %s538_s24 }
  0x1d   : > { %339 = vadd.xlane.f32.xlu1 %v338_v8 }
  0x1e   : > { %v307_v14 = vand.u32 2147483647, %v306_v13  ;;  %p540_p0 = pnand %p539_p13, %p678_p4  ;;  %p545_p5 = por %p544_p3, %p543_p2 }
  0x20   : > { %p541_p1 = pneg %p540_p0 }
  0x22   : > { %p546_p6 = pnand %p545_p5, %p541_p1 }
  0x8b   : > { %v312_v15 = vpop.permute.xlu0 %311 }
  0x8c   : > { %v314_v16 = vmul.f32 %v312_v15, %v307_v14 }
  0x8e   : > { %321 = vadd.xlane.f32.xlu0 %v314_v16 }
  0x90   : > { %v340_v17 = vpop.xlane.xlu1 %339 }
  0x91   : > { %v341_v18 = vrot.slane %v340_v17, 4 }
  0x93   : > { %v342_v19 = vadd.f32 %v341_v18, %v340_v17 }
  0x95   : > { %v343_v20 = vrot.slane %v342_v19, 2 }
  0x97   : > { %v344_v24 = vadd.f32 %v343_v20, %v342_v19 }
  0x99   : > { %v345_v27 = vrot.slane %v344_v24, 1 }
  0x9b   : > { %v346_v30 = vadd.f32 %v345_v27, %v344_v24 }
 0x101   : > { %v322_v21 = vpop.xlane.xlu0 %321 }
 0x102   : > { %v323_v22 = vrot.slane %v322_v21, 4 }
 0x104   : > { %v324_v23 = vadd.f32 %v323_v22, %v322_v21 }
 0x106   : > { %v325_v25 = vrot.slane %v324_v23, 2 }
 0x108   : > { %v326_v26 = vadd.f32 %v325_v25, %v324_v23 }
 0x10a   : > { %v327_v28 = vrot.slane %v326_v26, 1 }
 0x10c   : > { %v328_v29 = vadd.f32 %v327_v28, %v326_v26 }
 0x10e   : > { %459 = vpush %v328_v29 }
 0x10f   : > { %461 = vpush %v346_v30 }
 0x13f   : > { %s460_s27 = spop %459 }
 0x140   : > { %s462_s8 = spop %461 }
 0x141   : > { %s771_s8 = smov (!%p330_p12, %s462_s8), 0.0 }
 0x142   : > { %s349_s12 = sadd.f32 %s460_s27, %s771_s8 }
 0x144   : > { %v350_v31 = vstv %s349_s12 }
 0x145   : > { %351 = vst [vmem:[%s277_s28] sm:$0xff] %v350_v31 }
 0x146   : > { %549 = shalt.err (!%p546_p6)
}
 0x147   : > { %463 = dma.vmem_to_hbm [thread:$0]  (%p678_p4), %s366_s30, 128, %s368_s11, %s353_s13  }
 0x148 PF: > { %p469_p7 = scmp.ge.s32.totalorder %s600_s26, 2  ;;  %s379_s15 = sand.u32 1, %s580_s21  }
 0x149   : > { %s380_s27 = scalar_lea.sflag [#allocation4], %s379_s15 }
 0x14a   : > { %p466_p9 = pnand %p469_p7, %p685_p8 }
 0x14c   : > { %p467_p10 = pneg %p466_p9 }
 0x14e   : > { %575 = dma.done.wait (%p467_p10), %s380_s27, 128  }
 0x14f   : > { %577 = vsyncadd (%p467_p10), %s380_s27, 4294967168  ;;  %s19_s26 = sadd.s32 1, %s600_s26   ;;  %s763_s21 = smov %s584_s22 }
 0x150   : > { %p16_p11 = scmp.ge.s32.totalorder %s19_s26, 4   ;;  %s764_s22 = smov %s588_s23 }
 0x151   : > { %s765_s23 = smov %s691_s10  ;;  %s766_s24 = smov %s596_s25 }
 0x152   : > { %s767_s25 = smov %s769_s29  ;;  %18 = sbr.rel (!%p16_p11) target bundleno = 4 (0x4), region = 90 }
 0x157   :  { %386 = vsyncpa [#allocation4], 1 }
 0x158   :  { %388 = vsyncpa [#allocation4 + $0x1], 1 }

</bundles_post_ra>
